<compile_context>
chip_gen: v7x
topology: tpu7x:2x2x1
jax: 0.10.0
libtpu: 0.0.40
codegen_flags: <defaults>
</compile_context>

<pallas_src>
import functools

import jax
import jax.numpy as jnp
from jax.experimental import pallas as pl
from jax.experimental.pallas import tpu as pltpu


def _round_up(x, n):
    return ((x + n - 1) // n) * n


# ---------------------------------------------------------------------------
# Kernel
# ---------------------------------------------------------------------------
def _lora_kernel(x_ref, bt_ref, at_ref, o_ref):
    # x_ref : (tm, in_features)        activation row tile
    # bt_ref: (in_features, rank_p)    pre-transposed, lane-padded B.weight
    # at_ref: (rank_p, tn)             pre-transposed, padded A.weight tile
    # o_ref : (tm, tn)
    x = x_ref[...]
    # t = x @ B^T  -> (tm, rank_p); f32 accumulation on the MXU.
    t = jnp.dot(x, bt_ref[...], preferred_element_type=jnp.float32)
    # Keep second matmul's LHS in the activation dtype (no-op for f32, halves
    # footprint / MXU passes for bf16); still accumulate in f32.
    t = t.astype(x.dtype)
    out = jnp.dot(t, at_ref[...], preferred_element_type=jnp.float32)
    o_ref[...] = out.astype(o_ref.dtype)


# ---------------------------------------------------------------------------
# One-time weight preparation (hoisted out of the per-call path)
# ---------------------------------------------------------------------------
def prepare_lora_weights(b_w, a_w):
    """Transpose + pad LoRA weights once (cache the result for static weights).

    b_w: (rank, in_features)   PyTorch layout of B.weight
    a_w: (out_features, rank)  PyTorch layout of A.weight
    Returns (bt, at, out_features) where
      bt: (in_features, rank_p)        rank zero-padded to a 128-lane multiple
      at: (rank_p, out_stored)         out padded to 128 only if it is narrow
    """
    rank, in_features = b_w.shape
    out_features, rank2 = a_w.shape
    assert rank == rank2, (b_w.shape, a_w.shape)

    rank_p = _round_up(rank, 128)
    if out_features % 128 != 0 and out_features < 256:
        out_stored = _round_up(out_features, 128)   # lane-dense narrow output
    else:
        out_stored = out_features                   # avoid post-kernel slice pass

    bt = jnp.pad(b_w.T, ((0, 0), (0, rank_p - rank)))
    at = jnp.pad(a_w.T, ((0, rank_p - rank), (0, out_stored - out_features)))
    return bt, at, out_features


def _vmem_capacity_bytes():
    try:
        return int(pltpu.get_tpu_info().vmem_capacity_bytes)
    except Exception:
        return 64 * 1024 * 1024  # conservative fallback (v7x per-core size)


# ---------------------------------------------------------------------------
# Forward pass with prepared weights
# ---------------------------------------------------------------------------
@functools.partial(jax.jit, static_argnames=("out_features",))
def lora_linear_prepared(x, bt, at, *, out_features):
    in_features = x.shape[-1]
    rank_p = bt.shape[1]
    out_stored = at.shape[1]

    lead_shape = x.shape[:-1]
    m = 1
    for d in lead_shape:
        m *= d
    x2d = x.reshape(m, in_features)

    itemsize = jnp.dtype(x.dtype).itemsize
    sublane = 8 if itemsize >= 4 else (32 // itemsize)   # 8 f32, 16 bf16, 32 i8

    # Padded (VMEM layout) sizes so the byte accounting matches reality.
    in_lanes = _round_up(in_features, 128)
    in_subl = _round_up(in_features, sublane)

    capacity = _vmem_capacity_bytes()
    budget = min(int(0.45 * capacity), 48 * 1024 * 1024)

    def est_bytes(tm, tn, n_tiles):
        tn_p = _round_up(tn, 128)
        x_tile = 2 * tm * in_lanes * itemsize                # double-buffered
        o_tile = 2 * tm * tn_p * itemsize                    # double-buffered
        bt_buf = 1 * in_subl * rank_p * itemsize             # Buffered(1)
        at_buf = (1 if n_tiles == 1 else 2) * rank_p * tn_p * itemsize
        tmp = tm * rank_p * (4 + itemsize) + tm * tn_p * 4   # f32 temporaries
        return x_tile + o_tile + bt_buf + at_buf + tmp

    # --- Row tile: large (HBM roofline), but guarantee >=2 grid steps when
    #     possible so the pipeline and v7x's second TensorCore get work.
    tm_default = 1024 if capacity >= 100 * 1024 * 1024 else 512
    tm = min(tm_default, max(sublane, _round_up(pl.cdiv(m, 2), sublane)))

    # --- Prefer adding an out-feature axis over shrinking tm when VMEM-tight.
    tn_candidates = [out_stored] + [t for t in (2048, 1024, 512, 256, 128)
                                    if t < out_stored]

    def pick_tn(tm_):
        for tn_ in tn_candidates:
            if est_bytes(tm_, tn_, pl.cdiv(out_stored, tn_)) <= budget:
                return tn_
        return None

    tn = pick_tn(tm)
    while tn is None and tm > sublane:
        tm = max(sublane, _round_up(tm // 2, sublane))
        tn = pick_tn(tm)
    if tn is None:
        tn = tn_candidates[-1]

    m_tiles = pl.cdiv(m, tm)
    n_tiles = pl.cdiv(out_stored, tn)

    vmem_limit = int(min(max(2 * est_bytes(tm, tn, n_tiles), 16 * 1024 * 1024),
                         int(0.6 * capacity)))

    # Advisory cost estimate (LoRA is HBM-bandwidth-bound at small rank).
    flops = 2 * m * rank_p * (in_features + out_features)
    bytes_accessed = (m * in_features + m * out_stored
                      + in_features * rank_p + rank_p * out_stored) * itemsize
    cost = pl.CostEstimate(flops=flops, transcendentals=0,
                           bytes_accessed=bytes_accessed)

    # Weights are grid-invariant (bt always; at too when n_tiles == 1):
    # single-buffer them to halve their VMEM footprint.
    at_mode = pl.Buffered(1) if n_tiles == 1 else None

    out2d = pl.pallas_call(
        _lora_kernel,
        out_shape=jax.ShapeDtypeStruct((m, out_stored), x.dtype),
        grid_spec=pltpu.PrefetchScalarGridSpec(
            num_scalar_prefetch=0,
            grid=(m_tiles, n_tiles),          # M outer, N inner (x revisit-skip)
            in_specs=[
                pl.BlockSpec((tm, in_features), lambda i, j: (i, 0)),
                pl.BlockSpec((in_features, rank_p), lambda i, j: (0, 0),
                             pipeline_mode=pl.Buffered(1)),
                pl.BlockSpec((rank_p, tn), lambda i, j: (0, j),
                             pipeline_mode=at_mode),
            ],
            out_specs=pl.BlockSpec((tm, tn), lambda i, j: (i, j)),
        ),
        compiler_params=pltpu.CompilerParams(
            dimension_semantics=("parallel", "parallel"),
            vmem_limit_bytes=vmem_limit,
        ),
        cost_estimate=cost,
    )(x2d, bt, at)

    if out_stored != out_features:
        out2d = out2d[:, :out_features]
    return out2d.reshape(*lead_shape, out_features)


# Convenience one-shot wrapper (prep + call); prefer caching the prepared
# weights across calls for static LoRA weights.
def lora_linear(x, b_w, a_w):
    bt, at, out_features = prepare_lora_weights(b_w, a_w)
    return lora_linear_prepared(x, bt, at, out_features=out_features)


if __name__ == "__main__":
    # Module hyper-parameters (no pretrained_weight branch -> random init).
    # TODO(synk): the pretrained_weight SVD initialization path (torch.svd) is
    # init-time only and not part of the forward pass; not implemented.
    in_features = 32
    out_features = 32
    rank_req = 4
    rank = min(rank_req, in_features, out_features)

    batch, seq = 2, 8

    key = jax.random.PRNGKey(0)
    kx, kb, ka = jax.random.split(key, 3)

    # Input activations.
    x = jax.random.normal(kx, (batch, seq, in_features), dtype=jnp.float32)

    # B.weight: nn.Linear default init -> uniform(-1/sqrt(in), 1/sqrt(in))
    bound = 1.0 / (in_features ** 0.5)
    b_w = jax.random.uniform(
        kb, (rank, in_features), dtype=jnp.float32, minval=-bound, maxval=bound
    )
    # A.weight: nn.init.normal_(mean=0.0, std=1e-4)
    a_w = 1e-4 * jax.random.normal(ka, (out_features, rank), dtype=jnp.float32)

    # One-time weight prep (cacheable), then the pallas kernel call.
    bt, at, out_f = prepare_lora_weights(b_w, a_w)
    out = lora_linear_prepared(x, bt, at, out_features=out_f)
    out = jax.block_until_ready(out)

    # Pure-JAX reference: out = (x @ B^T) @ A^T
    ref = jnp.einsum("bsi,ri->bsr", x, b_w)
    ref = jnp.einsum("bsr,or->bso", ref, a_w)

    assert out.shape == (batch, seq, out_features), out.shape
    assert jnp.allclose(out, ref, atol=1e-5, rtol=1e-5), "mismatch vs reference"

    print("KERNEL_OK")
</pallas_src>

<mosaic_0001>
module attributes {stable_mosaic.version = 11 : i64} {
  func.func @_lora_kernel(%arg0: i32, %arg1: i32, %arg2: memref<8x32xf32, #tpu.memory_space<vmem>>, %arg3: memref<32x128xf32, #tpu.memory_space<vmem>>, %arg4: memref<128x128xf32, #tpu.memory_space<vmem>>, %arg5: memref<8x128xf32, #tpu.memory_space<vmem>>) attributes {dimension_semantics = [#tpu.dimension_semantics<parallel>, #tpu.dimension_semantics<parallel>], iteration_bounds = array<i64: 2, 1>, scalar_prefetch = 0 : i64, scratch_operands = 0 : i64, tpu.core_type = #tpu.core_type<tc>, window_params = [{transform_indices = @transform_0, window_bounds = array<i64: 8, 32>}, {pipeline_mode = #tpu.pipeline_mode<synchronous>, transform_indices = @transform_1, window_bounds = array<i64: 32, 128>}, {pipeline_mode = #tpu.pipeline_mode<synchronous>, transform_indices = @transform_2, window_bounds = array<i64: 128, 128>}, {transform_indices = @transform_3, window_bounds = array<i64: 8, 128>}]} {
    %c0 = arith.constant 0 : index
    %c0_0 = arith.constant 0 : index
    %0 = vector.load %arg2[%c0, %c0_0] : memref<8x32xf32, #tpu.memory_space<vmem>>, vector<8x32xf32>
    %c0_1 = arith.constant 0 : index
    %c0_2 = arith.constant 0 : index
    %1 = vector.load %arg3[%c0_1, %c0_2] : memref<32x128xf32, #tpu.memory_space<vmem>>, vector<32x128xf32>
    %cst = arith.constant dense<0.000000e+00> : vector<8x128xf32>
    %2 = tpu.matmul %0, %1, %cst {dimension_numbers = #tpu.dot_dimension_numbers<[1], [0], [0], [1], [0, 0, 1, 1], [], []>} : vector<8x32xf32>, vector<32x128xf32>, vector<8x128xf32> -> vector<8x128xf32>
    %c0_3 = arith.constant 0 : index
    %c0_4 = arith.constant 0 : index
    %3 = vector.load %arg4[%c0_3, %c0_4] : memref<128x128xf32, #tpu.memory_space<vmem>>, vector<128x128xf32>
    %cst_5 = arith.constant dense<0.000000e+00> : vector<8x128xf32>
    %4 = tpu.matmul %2, %3, %cst_5 {dimension_numbers = #tpu.dot_dimension_numbers<[1], [0], [0], [1], [0, 0, 1, 1], [], []>} : vector<8x128xf32>, vector<128x128xf32>, vector<8x128xf32> -> vector<8x128xf32>
    %c0_6 = arith.constant 0 : index
    %c0_7 = arith.constant 0 : index
    %5 = vector.load %arg5[%c0_6, %c0_7] : memref<8x128xf32, #tpu.memory_space<vmem>>, vector<8x128xf32>
    tpu.vector_store %arg5[%c0_6, %c0_7], %4 {strides = array<i32>} : memref<8x128xf32, #tpu.memory_space<vmem>>, vector<8x128xf32>,
    return
  }
  func.func @transform_0(%arg0: i32, %arg1: i32) -> (i32, i32) {
    %c0_i32 = arith.constant 0 : i32
    %c0_i32_0 = arith.constant 0 : i32
    return %arg0, %c0_i32 : i32, i32
  }
  func.func @transform_1(%arg0: i32, %arg1: i32) -> (i32, i32) {
    %c0_i32 = arith.constant 0 : i32
    %c0_i32_0 = arith.constant 0 : i32
    %c0_i32_1 = arith.constant 0 : i32
    return %c0_i32, %c0_i32_0 : i32, i32
  }
  func.func @transform_2(%arg0: i32, %arg1: i32) -> (i32, i32) {
    %c0_i32 = arith.constant 0 : i32
    %c0_i32_0 = arith.constant 0 : i32
    return %c0_i32, %arg1 : i32, i32
  }
  func.func @transform_3(%arg0: i32, %arg1: i32) -> (i32, i32) {
    %c0_i32 = arith.constant 0 : i32
    return %arg0, %arg1 : i32, i32
  }
}

</mosaic_0001>

<bundles_post_ra>
// kernel: lora_linear_prepared.1
= control target key start
LH: loop header
LB: loop body
LE: loop exit
PB: predicated region body
PF: predicated region fallthrough
CT: control target
= control target key end

     0   :  { %8 = vsyncpa [#allocation3], 0  ;;  %s1072_s0 = inlined_call_operand.hbm [shape: f32[16,32], index: 0, kind: input, shape index: {}]   ;;  %s1073_s1 = inlined_call_operand.hbm [shape: f32[32,128], index: 1, kind: input, shape index: {}]   ;;  %s1074_s2 = inlined_call_operand.hbm [shape: f32[128,128], index: 2, kind: input, shape index: {}]   ;;  %s1075_s3 = inlined_call_operand.vmem [shape: f32[16,128], index: 3, kind: output, shape index: {}]  }
   0x1   :  { %10 = vsyncpa [#allocation3 + $0x1], 0 }
   0x2   :  { %11 = vsyncpa [#allocation5], 0  ;;  %s877_s12 = smov 0   ;;  %s879_s13 = smov 0  }
   0x3   :  { %s881_s14 = smov 0   ;;  %s883_s15 = smov 0  }
   0x4   :  { %s885_s16 = smov 0   ;;  %s887_s17 = smov 0  }
   0x5 LB: > { %s512_s18 = sadd.s32 4294967295, %s847_s17   ;;  %p49_p0 = scmp.ne.s32.totalorder %s831_s13, %s827_s12  ;;  %s847_s17 = sphi %s887_s17, %s17_s17   ;;  %s843_s16 = sphi %s885_s16, %s1093_s16   ;;  %s839_s15 = sphi %s883_s15, %s1092_s15   ;;  %s835_s14 = sphi %s881_s14, %s1091_s14   ;;  %s831_s13 = sphi %s879_s13, %s1090_s13   ;;  %s827_s12 = sphi %s877_s12, %s1089_s12  }
   0x6   : > { %p907_p1 = scmp.eq.s32.totalorder %s512_s18, 0  ;;  %p514_p2 = scmp.ge.s32.totalorder %s847_s17, 1 }
   0x7   : > { %p135_p3 = scmp.lt.s32.totalorder %s847_s17, 3  ;;  %s849_s22 = smov [#allocation4]  }
   0x8   : > { %s1080_s19 = scalar_select %p907_p1, 1, 0 }
   0x9   : > { %p915_p4 = por %p907_p1, %p49_p0  ;;  %p919_p5 = pnand %p514_p2, %p135_p3 }
   0xa   : > { %s147_s23 = sshll.u32 %s849_s22, 4  ;;  %s850_s25 = smov [#allocation6]   ;;  %s148_s23 = int_to_ptr.vmem [resolvable:$true] %s147_s23 }
   0xb   : > { %s1081_s20 = scalar_select %p915_p4, 1, 0 }
   0xc   : > { %s1082_s21 = scalar_select %p919_p5, 1, 0 }
   0xd   : > { %p636_p6 = pneg %p919_p5  ;;  %s162_s26 = sshll.u32 %s850_s25, 4  ;;  %s931_s26 = int_to_ptr.vmem [resolvable:$true] %s162_s26 }
   0xe   : > { %s707_s29 = scalar_lea.hbm %s1073_s1, 512 }
   0xf   : > { %p927_p7 = pnand %p636_p6, %p907_p1  ;;  %p708_p8 = scmp.ne.s32.totalorder %s1073_s1, %s707_s29 }
  0x10   : > { %p714_p12 = scmp.lt.u32.totalorder %s707_s29, %s1073_s1 }
  0x11   : > { %p709_p9 = pneg %p927_p7 }
  0x13   : > { %p710_p10 = pnand %p709_p9, %p708_p8 }
  0x15   : > { %p711_p11 = pneg %p710_p10 }
  0x17   : > { %p716_p13 = pnand %p714_p12, %p711_p11 }
  0x19   : > { %719 = shalt.err (!%p716_p13)
}
  0x1a   : > { %s720_s7 = scalar_lea.vmem %s148_s23, 512  ;;  %p728_p6 = scmp.lt.s32.totalorder %s148_s23, %s148_s23 }
  0x1b   : > { %p721_p0 = scmp.ne.s32.totalorder %s148_s23, %s720_s7  ;;  %p729_p1 = scmp.lt.s32.totalorder %s720_s7, %s720_s7 }
  0x1d   : > { %p723_p2 = pnand %p721_p0, %p709_p9  ;;  %p730_p4 = por %p729_p1, %p728_p6 }
  0x1f   : > { %p724_p3 = pneg %p723_p2 }
  0x21   : > { %p731_p5 = pnand %p730_p4, %p724_p3 }
  0x23   : > { %734 = shalt.err (!%p731_p5)
}
  0x24   : > { %s851_s8 = smov 128   ;;  %s852_s9 = smov 8  }
  0x25   : > { %639 = dma.hbm_to_vmem [thread:$0]  (!%p927_p7), %s1073_s1, 512, %s148_s23, [#allocation5], %s851_s8, %s851_s8, %s852_s9  }
  0x26   : > { %s735_s22 = scalar_lea.hbm %s1074_s2, 2048 }
  0x27   : > { %p736_p8 = scmp.ne.s32.totalorder %s1074_s2, %s735_s22  ;;  %p742_p5 = scmp.lt.u32.totalorder %s735_s22, %s1074_s2 }
  0x29   : > { %p738_p1 = pnand %p736_p8, %p709_p9 }
  0x2b   : > { %p739_p4 = pneg %p738_p1 }
  0x2d   : > { %p744_p10 = pnand %p742_p5, %p739_p4 }
  0x2f   : > { %747 = shalt.err (!%p744_p10)
}
  0x30   : > { %s748_s23 = scalar_lea.vmem %s931_s26, 2048  ;;  %p756_p0 = scmp.lt.s32.totalorder %s931_s26, %s931_s26 }
  0x31   : > { %p749_p11 = scmp.ne.s32.totalorder %s931_s26, %s748_s23  ;;  %p757_p2 = scmp.lt.s32.totalorder %s748_s23, %s748_s23 }
  0x33   : > { %p751_p12 = pnand %p749_p11, %p709_p9  ;;  %p758_p3 = por %p757_p2, %p756_p0 }
  0x35   : > { %p752_p13 = pneg %p751_p12 }
  0x37   : > { %p759_p6 = pnand %p758_p3, %p752_p13 }
  0x39   : > { %762 = shalt.err (!%p759_p6)
}
  0x3a   : > { %642 = dma.hbm_to_vmem [thread:$0]  (!%p927_p7), %s1074_s2, 2048, %s931_s26, [#allocation5], %s851_s8, %s851_s8, %s852_s9  }
  0x3b   : > { %s29_s5 = sadd.s32 1, %s843_s16  ;;  %s36_s6 = sadd.s32 1, %s835_s14 }
  0x3c   : > { %p31_p9 = scmp.ge.s32.totalorder %s29_s5, 2  ;;  %p43_p8 = scmp.ne.s32.totalorder %s835_s14, %s831_s13 }
  0x3d   : > { %p44_p1 = scmp.eq.s32.totalorder %s847_s17, 0  ;;  %p649_p4 = scmp.lt.s32.totalorder %s847_s17, 2 }
  0x3e   : > { %s1095_s5 = smov (%p31_p9, %s29_s5), 0  ;;  %s176_s24 = sand.u32 1, %s835_s14  }
  0x3f   : > { %p45_p5 = por %p44_p1, %p43_p8  ;;  %s33_s7 = ssub.s32 %s843_s16, %s1095_s5 }
  0x40   : > { %p34_p10 = scmp.eq.s32.totalorder %s33_s7, 0  ;;  %s518_s10 = sshll.u32 %s176_s24, 3 }
  0x41   : > { %s519_s11 = sshll.u32 %s843_s16, 7  ;;  %s180_s9 = scalar_lea.vmem [#allocation2], %s518_s10 }
  0x42   : > { %s993_s12 = scalar_select %p34_p10, %s835_s14, %s36_s6  }
  0x43   : > { %s998_s8 = scalar_lea.hbm %s1072_s0, %s519_s11  ;;  %s187_s22 = sshll.u32 %s180_s9, 4  ;;  %s1000_s22 = int_to_ptr.vmem [resolvable:$true] %s187_s22 }
  0x44   : > { %p1004_p7 = pnand %p649_p4, %p45_p5  ;;  %s177_s27 = scalar_lea.sflag [#allocation3], %s176_s24 }
  0x45   : > { %s763_s28 = scalar_lea.hbm %s998_s8, 128  ;;  %s768_s30 = scalar_lea.hbm %s1072_s0, 256 }
  0x46   : > { %p764_p11 = scmp.ne.s32.totalorder %s998_s8, %s763_s28  ;;  %p765_p12 = pneg %p1004_p7 }
  0x47   : > { %p769_p2 = scmp.lt.u32.totalorder %s998_s8, %s1072_s0  ;;  %p770_p3 = scmp.lt.u32.totalorder %s768_s30, %s763_s28 }
  0x48   : > { %p766_p13 = pnand %p765_p12, %p764_p11  ;;  %p772_p9 = scmp.lt.u32.totalorder %s763_s28, %s998_s8 }
  0x49   : > { %p771_p6 = por %p770_p3, %p769_p2 }
  0x4a   : > { %p767_p0 = pneg %p766_p13 }
  0x4b   : > { %p773_p8 = por %p772_p9, %p771_p6 }
  0x4d   : > { %p774_p1 = pnand %p773_p8, %p767_p0 }
  0x4f   : > { %777 = shalt.err (!%p774_p1)
}
  0x50   : > { %s778_s24 = scalar_lea.vmem %s1000_s22, 128  ;;  %s853_s7 = smov [#allocation2]  }
  0x51   : > { %p779_p4 = scmp.ne.s32.totalorder %s1000_s22, %s778_s24  ;;  %s783_s10 = sshll.u32 %s853_s7, 4  ;;  %s784_s10 = int_to_ptr.vmem [resolvable:$false] %s783_s10 }
  0x52   : > { %s785_s11 = scalar_lea.vmem %s784_s10, 256  ;;  %p786_p11 = scmp.lt.s32.totalorder %s1000_s22, %s784_s10 }
  0x53   : > { %p781_p5 = pnand %p779_p4, %p765_p12  ;;  %p787_p13 = scmp.lt.s32.totalorder %s785_s11, %s778_s24 }
  0x55   : > { %p782_p10 = pneg %p781_p5  ;;  %p788_p2 = por %p787_p13, %p786_p11 }
  0x57   : > { %p789_p3 = pnand %p788_p2, %p782_p10 }
  0x59   : > { %792 = shalt.err (!%p789_p3)
}
  0x5a   : > { %646 = dma.hbm_to_vmem [thread:$0]  (!%p1004_p7), %s998_s8, 128, %s1000_s22, %s177_s27  }
  0x5b   : > { %p1085_p0 = scmp.ne.s32.totalorder %s1082_s21, 0 }
  0x5c   : > { %s198_s18 = sand.u32 (!%p1085_p0), 1, %s831_s13   ;;  %p1086_p12 = scmp.ne.s32.totalorder (!%p1085_p0), %s1081_s20, 0 }
  0x5d   : > { %196 = sbr.rel (%p1085_p0) target bundleno = 540 (0x21c), region = 32  ;;  %s1036_s26 = sshll.u32 (!%p1085_p0), %s198_s18, 3 }
  0x5e   : > { %s199_s9 = scalar_lea.sflag (!%p1085_p0), [#allocation3], %s198_s18  ;;  %s202_s28 = scalar_lea.vmem (!%p1085_p0), [#allocation2], %s1036_s26 }
  0x64   : > { %818 = dma.done.wait (%p1086_p12), %s199_s9, 128  }
  0x65   : > { %820 = vsyncadd (%p1086_p12), %s199_s9, 4294967168  ;;  %p1087_p6 = scmp.ne.s32.totalorder %s1080_s19, 0 }
  0x67   : > { %822 = dma.done.wait (%p1087_p6), [#allocation5], 2560  }
  0x68   : > { %824 = vsyncadd (%p1087_p6), [#allocation5], 4294964736  ;;  %v854_v0 = vmov 0.0|0.0   ;;  %vm855_vm0 = vmmov 0   ;;  %v856_v1 = vmov 0.0   ;;  %v243_v2 = vld [vmem:[#allocation4] sm:$0xff] }
  0x69   : > { %596 = vmatprep.subr.bf16.mxu0 %v854_v0  ;;  %558 = vmatprep.mubr.msk.f32.mxu0 %vm855_vm0, %v856_v1  ;;  %v244_v3 = vld [vmem:[#allocation4 + $0x8] sm:$0xff]  ;;  %v245_v4 = vld [vmem:[#allocation4 + $0x10] sm:$0xff]  ;;  %v246_v6 = vld [vmem:[#allocation4 + $0x18] sm:$0xff]  ;;  %vm247_vm1 = vcmask 261120   ;;  %p235_p7 = scmp.lt.s32.totalorder %s839_s15, 1 }
  0x6a   : > { %602 = vmatprep.subr.bf16.mxu1 %v854_v0  ;;  %593 = vmatprep.mubr.msk.f32.mxu1 %vm855_vm0, %v856_v1  ;;  %v597_v5 = vpack.c.bf16 %v244_v3, %v243_v2  ;;  %v321_v7 = vld [vmem:[#allocation6] sm:$0xff]  ;;  %v322_v8 = vld [vmem:[#allocation6 + $0x8] sm:$0xff]  ;;  %v323_v9 = vld [vmem:[#allocation6 + $0x10] sm:$0xff]  ;;  %v600_v11 = vpack.c.bf16 %v246_v6, %v245_v4 }
  0x6b   : > { %v324_v10 = vld [vmem:[#allocation6 + $0x18] sm:$0xff]  ;;  %v603_v12 = vpack.c.bf16 %v322_v8, %v321_v7  ;;  %v325_v14 = vld [vmem:[#allocation6 + $0x20] sm:$0xff]  ;;  %v326_v15 = vld [vmem:[#allocation6 + $0x28] sm:$0xff]  ;;  %s1097_s15 = smov (!%p235_p7, %s839_s15), 1 }
  0x6c   : > { %598 = vmatpush3.bf16.msra.mxu0 %v597_v5  ;;  %v606_v13 = vpack.c.bf16 %v324_v10, %v323_v9  ;;  %v242_v16 = vld [vmem:[%s202_s28] sm:$0xff]  ;;  %v609_v17 = vpack.c.bf16 %v326_v15, %v325_v14  ;;  %v329_v21 = vld [vmem:[#allocation6 + $0x40] sm:$0xff]  ;;  %v330_v22 = vld [vmem:[#allocation6 + $0x48] sm:$0xff]  ;;  %s524_s19 = sshll.u32 %s1097_s15, 3 }
  0x6d   : > { %599 = vmatprep.subr.bf16.mxu0 %v854_v0  ;;  %604 = vmatpush3.bf16.msra.mxu1 %v603_v12  ;;  %v327_v18 = vld [vmem:[#allocation6 + $0x30] sm:$0xff]  ;;  %v328_v19 = vld [vmem:[#allocation6 + $0x38] sm:$0xff]  ;;  %v615_v23 = vpack.c.bf16 %v330_v22, %v329_v21  ;;  %v333_v27 = vld [vmem:[#allocation6 + $0x60] sm:$0xff]  ;;  %s241_s8 = scalar_lea.vmem %s1075_s3, %s524_s19 }
  0x6e   : > { %605 = vmatprep.subr.bf16.mxu1 %v854_v0  ;;  %v612_v20 = vpack.c.bf16 %v328_v19, %v327_v18  ;;  %v331_v24 = vld [vmem:[#allocation6 + $0x50] sm:$0xff]  ;;  %v332_v25 = vld [vmem:[#allocation6 + $0x58] sm:$0xff]  ;;  %v334_v28 = vld [vmem:[#allocation6 + $0x68] sm:$0xff] }
  0x6f   : > { %v618_v26 = vpack.c.bf16 %v332_v25, %v331_v24  ;;  %v621_v29 = vpack.c.bf16 %v334_v28, %v333_v27  ;;  %v335_v30 = vld [vmem:[#allocation6 + $0x70] sm:$0xff]  ;;  %v336_v31 = vld [vmem:[#allocation6 + $0x78] sm:$0xff] }
  0x70   : > { %601 = vmatpush3.bf16.msra.mxu0 %v600_v11  ;;  %v624_v32 = vpack.c.bf16 %v336_v31, %v335_v30 }
  0x71   : > { %607 = vmatpush3.bf16.msra.mxu1 %v606_v13 }
  0x72   : > { %608 = vmatprep.subr.bf16.mxu1 %v854_v0 }
  0x73   : > { %559 = vmatmul.mubr.msk.f32.vlgmr.msra.gmra.mrb[0].mxu0 %vm247_vm1, %v242_v16 }
  0x75   : > { %610 = vmatpush3.bf16.msra.mxu1 %v609_v17 }
  0x76   : > { %611 = vmatprep.subr.bf16.mxu1 %v854_v0 }
  0x79   : > { %613 = vmatpush3.bf16.msra.mxu1 %v612_v20 }
  0x7a   : > { %614 = vmatprep.subr.bf16.mxu1 %v854_v0 }
  0x7d   : > { %616 = vmatpush3.bf16.msra.mxu1 %v615_v23 }
  0x7e   : > { %617 = vmatprep.subr.bf16.mxu1 %v854_v0 }
  0x81   : > { %619 = vmatpush3.bf16.msra.mxu1 %v618_v26 }
  0x82   : > { %620 = vmatprep.subr.bf16.mxu1 %v854_v0 }
  0x85   : > { %622 = vmatpush3.bf16.msra.mxu1 %v621_v29 }
  0x86   : > { %623 = vmatprep.subr.bf16.mxu1 %v854_v0 }
  0x89   : > { %625 = vmatpush3.bf16.msra.mxu1 %v624_v32 }
 0x146   : > { %v317_v33 = vpop.f32.mrb[0].mxu0 }
 0x147   : > { %v560_v34 = vpop.f32.mrb[1].mxu0  ;;  %594 = vmatmul.mubr.f32.vlgmr.msra.gmra.mrb[0].mxu1 %v317_v33 }
 0x21a   : > { %v403_v35 = vpop.f32.mrb[0].mxu1 }
 0x21b   : > { %407 = vst [vmem:[%s241_s8] sm:$0xff] %v403_v35  ;;  %v595_v36 = vpop.f32.mrb[1].mxu1 }
 0x21c PF: > { %s17_s17 = sadd.s32 1, %s847_s17   ;;  %s1088_s22 = smov %s993_s12 }
 0x21d   : > { %p14_p9 = scmp.ge.s32.totalorder %s17_s17, 4   ;;  %s1089_s12 = smov %s831_s13 }
 0x21e   : > { %s1090_s13 = smov %s835_s14  ;;  %s1091_s14 = smov %s1088_s22 }
 0x21f   : > { %s1092_s15 = smov %s843_s16  ;;  %s1093_s16 = smov %s1095_s5 }
 0x220   :  { %16 = sbr.rel (!%p14_p9) target bundleno = 5 (0x5), region = 81 }
 0x227   :  { %433 = vsyncpa [#allocation3], 1 }
 0x228   :  { %435 = vsyncpa [#allocation3 + $0x1], 1 }
 0x229   :  { %436 = vsyncpa [#allocation5], 1 }

</bundles_post_ra>
